<compile_context>
chip_gen: v5e
topology: v5e:2x2
jax: 0.10.0
libtpu: 0.0.40
codegen_flags: <defaults>
</compile_context>

<pallas_src>
import functools

import jax
import jax.numpy as jnp
from jax import lax
from jax.experimental import pallas as pl
from jax.experimental.pallas import tpu as pltpu

LANES = 128        # fused weight slab width (one MXU pass feeds every head)
_EMB_ROWS = 8      # sublane-padded rows for the folded embedding table
_NEG = -1e30       # additive mask value for non-master lanes


# --------------------------- parameter preparation ---------------------------
def prepare_params(w_mc, b_mc, emb_table, w_actor, b_actor, *, compute_dtype=jnp.bfloat16):
    """One-time layout plumbing: fused, transposed, lane-padded weight slabs.

    compute_dtype=bf16 halves HBM->VMEM traffic for x and the weight slab (this
    kernel is HBM-bound, not MXU-bound); MXU accumulation is f32 and the whole
    epilogue (bias, argmax, embedding select) stays f32 on the VPU.
    """
    o_mc, d = w_mc.shape                      # o_mc = master_actions + 1
    a = w_actor.shape[0]                      # subpolicy_actions
    n_emb = emb_table.shape[0]
    assert n_emb == 2, "module hardcodes nn.Embedding(num_embeddings=2, ...)"
    ma = o_mc - 1
    o_total = o_mc + a                        # master logits | value | lower logits
    assert o_total <= LANES

    # Fused weight slab [D, LANES]:
    #   lanes [0, ma)          -> master logits
    #   lane  ma               -> value
    #   lanes [o_mc, o_mc + A) -> state_embedding half of the actor weight
    w_pad = jnp.zeros((d, LANES), jnp.float32)
    w_pad = w_pad.at[:, :o_mc].set(w_mc.T)
    w_pad = w_pad.at[:, o_mc:o_total].set(w_actor[:, d:].T)

    b_pad = jnp.zeros((1, LANES), jnp.float32)
    b_pad = b_pad.at[0, :o_mc].set(b_mc)
    b_pad = b_pad.at[0, o_mc:o_total].set(b_actor)

    # Fold the embedding through the actor's embedding half:
    #   one_hot(h) @ E @ We^T == (E @ We^T)[h]  ->  row select, no K=2 MXU dot.
    c = emb_table @ w_actor[:, :d].T                          # [n_emb, A]
    c_pad = jnp.zeros((_EMB_ROWS, LANES), jnp.float32)
    c_pad = c_pad.at[:n_emb, o_mc:o_total].set(c)

    # Additive master-lane mask: 0 on master-logit lanes, -1e30 elsewhere.
    lane_mask = jnp.where(jnp.arange(LANES) < ma, 0.0, _NEG).astype(jnp.float32)
    lane_mask = lane_mask.reshape(1, LANES)

    return dict(
        w_pad=w_pad.astype(compute_dtype),
        b_pad=b_pad,                 # bias / epilogue stay f32
        c_pad=c_pad,
        lane_mask=lane_mask,
        master_actions=ma,
        subpolicy_actions=a,
        input_size=d,
    )


# --------------------------------- kernel ------------------------------------
def _fused_head_kernel(x_ref, w_ref, b_ref, c_ref, mask_ref, out_ref):
    # One lane-dense MXU matmul feeds every head (f32 accumulation):
    #   y[:, :ma]            master logits
    #   y[:, ma]             value
    #   y[:, ma+1 : ma+1+A]  x-contribution to the lower-policy logits
    y = (
        jnp.dot(x_ref[...], w_ref[...], preferred_element_type=jnp.float32)
        + b_ref[...]
    )

    # Deterministic 'higher' action: argmax over the master-logit lanes.
    # TODO(synk): stand-in for sampling from CategoricalDistr(master_logits).
    masked = y + mask_ref[...]                      # -1e30 on non-master lanes
    row_max = jnp.max(masked, axis=-1, keepdims=True)
    lane = lax.broadcasted_iota(jnp.int32, y.shape, 1)
    higher = jnp.min(
        jnp.where(masked == row_max, lane, y.shape[-1]), axis=-1, keepdims=True
    )                                               # first-max index == argmax tie-break

    # Folded embedding contribution C[higher]; n_emb == 2 -> pure VPU select
    # (no gather, no K=2 MXU dot).  C is zero on master/value lanes.
    c = c_ref[...]
    emb_contrib = jnp.where(higher == 0, c[0:1, :], c[1:2, :])

    # Narrow, exact-width store: only the real lanes go back to HBM.
    # Rows of a ragged last block are never written back (Pallas masks them).
    out_ref[...] = (y + emb_contrib)[:, : out_ref.shape[-1]]


# ------------------------------ tiling helpers --------------------------------
def _round_up(v, m):
    return ((v + m - 1) // m) * m


@functools.lru_cache(maxsize=1)
def _vmem_budget_bytes():
    """~3/4 of this generation's physical VMEM (96 MiB v5e/v6e, 48 MiB v7x)."""
    try:
        cap = pltpu.get_tpu_info().vmem_capacity_bytes
    except Exception:                      # unknown part: assume the smallest (v7x)
        cap = 64 * 1024 * 1024
    return int(min(96 * 1024 * 1024, (cap * 3) // 4))


def _choose_block_m(m, d, x_bpe, out_w, vmem_limit, max_block_m):
    """Row tile from the VMEM budget: resident weights (single-buffered) plus
    double-buffered x and out tiles, with a few MiB of compiler headroom."""
    resident = d * LANES * x_bpe + (_EMB_ROWS + 2) * LANES * 4
    per_row = 2 * (d * x_bpe + out_w * 4)            # x tile + out tile, 2-deep each
    budget_rows = max((vmem_limit - resident - 4 * 1024 * 1024) // per_row, 16)
    if m <= min(256, budget_rows):
        return m                                     # tiny M: single (full-dim) tile
    # >=4 grid steps so the "parallel" axis shards across v7x's 2 TCs and pipelines.
    bm = min(max_block_m, budget_rows, _round_up(pl.cdiv(m, 4), 16))
    return max(16, (bm // 16) * 16)                  # multiple of 16: bf16 sublane packing


def _resident_spec(block_shape):
    """Constant-index resident operand; single-buffered to free VMEM for x tiles."""
    index_map = lambda i, _n=len(block_shape): (0,) * _n
    try:
        return pl.BlockSpec(block_shape, index_map, pipeline_mode=pl.Buffered(1))
    except TypeError:                                # BlockSpec without pipeline_mode
        return pl.BlockSpec(block_shape, index_map)


# -------------------------------- wrapper ------------------------------------
@functools.partial(
    jax.jit, static_argnames=("master_actions", "subpolicy_actions", "block_m")
)
def _forward(x, w_pad, b_pad, c_pad, lane_mask, *, master_actions, subpolicy_actions,
             block_m=1024):
    t, b, d = x.shape
    ma = master_actions
    o_total = ma + 1 + subpolicy_actions
    m = t * b

    cdt = w_pad.dtype
    x2d = x.reshape(m, d).astype(cdt)                # fuses with the kernel under jit

    vmem_limit = _vmem_budget_bytes()
    bm = _choose_block_m(m, d, jnp.dtype(cdt).itemsize, o_total, vmem_limit, block_m)
    grid = (pl.cdiv(m, bm),)                         # ragged last block; no jnp.pad copy

    out = pl.pallas_call(
        _fused_head_kernel,
        out_shape=jax.ShapeDtypeStruct((m, o_total), jnp.float32),
        grid=grid,
        in_specs=[
            pl.BlockSpec((bm, d), lambda i: (i, 0)),     # x tile (double-buffered)
            _resident_spec((d, LANES)),                  # fused weights (resident)
            _resident_spec((1, LANES)),                  # fused bias (resident)
            _resident_spec((_EMB_ROWS, LANES)),          # folded embedding (resident)
            _resident_spec((1, LANES)),                  # master-lane additive mask
        ],
        out_specs=pl.BlockSpec((bm, o_total), lambda i: (i, 0)),
        compiler_params=pltpu.CompilerParams(
            dimension_semantics=("parallel",),           # megacore / v7x 2-TC split over M
            vmem_limit_bytes=int(vmem_limit),
        ),
    )(x2d, w_pad, b_pad, c_pad, lane_mask)

    master_logits = out[:, :ma].reshape(t, b, ma)
    values = out[:, ma:ma + 1].reshape(t, b, 1)          # values.view(T, B, -1)
    lower_logits = out[:, ma + 1:].reshape(t, b, subpolicy_actions)
    return master_logits, values, lower_logits


def conditioned_head_forward(x, params, *, block_m=1024):
    """x: [T, B, input_size] -> (master_logits, values, lower_logits)."""
    assert x.shape[-1] == params["input_size"]
    return _forward(
        x, params["w_pad"], params["b_pad"], params["c_pad"], params["lane_mask"],
        master_actions=params["master_actions"],
        subpolicy_actions=params["subpolicy_actions"],
        block_m=block_m,
    )


# --------------------------------- driver ------------------------------------
if __name__ == "__main__":
    T, B = 2, 4
    input_size = 32
    master_actions = 2
    subpolicy_actions = 2

    key = jax.random.PRNGKey(0)
    k_mc, k_emb, k_actor, k_x = jax.random.split(key, 4)

    # Parameter init mirroring the module's __init__:
    #   nn.Linear weights -> orthogonal, biases -> 0, nn.Embedding -> N(0, 1).
    orth = jax.nn.initializers.orthogonal()
    w_mc = orth(k_mc, (master_actions + 1, input_size), jnp.float32)
    b_mc = jnp.zeros((master_actions + 1,), jnp.float32)
    emb_table = jax.random.normal(k_emb, (2, input_size), jnp.float32)
    w_actor = orth(k_actor, (subpolicy_actions, 2 * input_size), jnp.float32)
    b_actor = jnp.zeros((subpolicy_actions,), jnp.float32)

    x = jax.random.normal(k_x, (T, B, input_size), jnp.float32)

    # Pure-JAX f32 reference.
    x2d = x.reshape(T * B, input_size)
    ref_out = x2d @ w_mc.T + b_mc
    ref_master = ref_out[:, :master_actions]
    ref_values = ref_out[:, master_actions:]

    def ref_lower_from_master(master_logits_2d):
        # Conditioned on the kernel's own (deterministic argmax) higher action so
        # near-tie argmax flips under bf16 cannot make the check flaky.
        higher = jnp.argmax(master_logits_2d, axis=-1)
        emb = emb_table[higher]
        return jnp.concatenate([emb, x2d], axis=-1) @ w_actor.T + b_actor

    for cdt, tol in ((jnp.bfloat16, 5e-2), (jnp.float32, 1e-5)):
        params = prepare_params(w_mc, b_mc, emb_table, w_actor, b_actor,
                                compute_dtype=cdt)
        master_logits, values, lower_logits = conditioned_head_forward(x, params)
        jax.block_until_ready((master_logits, values, lower_logits))

        ml2 = master_logits.reshape(T * B, master_actions)
        v2 = values.reshape(T * B, 1)
        ll2 = lower_logits.reshape(T * B, subpolicy_actions)

        assert jnp.allclose(ml2, ref_master, atol=tol, rtol=tol)
        assert jnp.allclose(v2, ref_values, atol=tol, rtol=tol)
        assert jnp.allclose(ll2, ref_lower_from_master(ml2), atol=tol, rtol=tol)

    print("KERNEL_OK")
</pallas_src>

<mosaic_0001>
module attributes {stable_mosaic.version = 11 : i64} {
  func.func @_fused_head_kernel(%arg0: i32, %arg1: memref<8x32xbf16, #tpu.memory_space<vmem>>, %arg2: memref<32x128xbf16, #tpu.memory_space<vmem>>, %arg3: memref<1x128xf32, #tpu.memory_space<vmem>>, %arg4: memref<8x128xf32, #tpu.memory_space<vmem>>, %arg5: memref<1x128xf32, #tpu.memory_space<vmem>>, %arg6: memref<8x5xf32, #tpu.memory_space<vmem>>) attributes {dimension_semantics = [#tpu.dimension_semantics<parallel>], iteration_bounds = array<i64: 1>, scalar_prefetch = 0 : i64, scratch_operands = 0 : i64, tpu.core_type = #tpu.core_type<tc>, window_params = [{transform_indices = @transform_0, window_bounds = array<i64: 8, 32>}, {pipeline_mode = #tpu.pipeline_mode<synchronous>, transform_indices = @transform_1, window_bounds = array<i64: 32, 128>}, {pipeline_mode = #tpu.pipeline_mode<synchronous>, transform_indices = @transform_2, window_bounds = array<i64: 1, 128>}, {pipeline_mode = #tpu.pipeline_mode<synchronous>, transform_indices = @transform_3, window_bounds = array<i64: 8, 128>}, {pipeline_mode = #tpu.pipeline_mode<synchronous>, transform_indices = @transform_4, window_bounds = array<i64: 1, 128>}, {transform_indices = @transform_5, window_bounds = array<i64: 8, 5>}]} {
    %c0 = arith.constant 0 : index
    %c0_0 = arith.constant 0 : index
    %0 = vector.load %arg1[%c0, %c0_0] : memref<8x32xbf16, #tpu.memory_space<vmem>>, vector<8x32xbf16>
    %c0_1 = arith.constant 0 : index
    %c0_2 = arith.constant 0 : index
    %1 = vector.load %arg2[%c0_1, %c0_2] : memref<32x128xbf16, #tpu.memory_space<vmem>>, vector<32x128xbf16>
    %cst = arith.constant dense<0.000000e+00> : vector<8x128xf32>
    %2 = tpu.matmul %0, %1, %cst {dimension_numbers = #tpu.dot_dimension_numbers<[1], [0], [0], [1], [0, 0, 1, 1], [], []>} : vector<8x32xbf16>, vector<32x128xbf16>, vector<8x128xf32> -> vector<8x128xf32>
    %c0_3 = arith.constant 0 : index
    %c0_4 = arith.constant 0 : index
    %3 = vector.load %arg3[%c0_3, %c0_4] : memref<1x128xf32, #tpu.memory_space<vmem>>, vector<1x128xf32>
    %4 = vector.broadcast %3 : vector<1x128xf32> to vector<8x128xf32>
    %5 = arith.addf %2, %4 : vector<8x128xf32>
    %c0_5 = arith.constant 0 : index
    %c0_6 = arith.constant 0 : index
    %6 = vector.load %arg5[%c0_5, %c0_6] : memref<1x128xf32, #tpu.memory_space<vmem>>, vector<1x128xf32>
    %7 = vector.broadcast %6 : vector<1x128xf32> to vector<8x128xf32>
    %8 = arith.addf %5, %7 : vector<8x128xf32>
    %cst_7 = arith.constant dense<0xFF800000> : vector<8xf32>
    %9 = vector.multi_reduction <maximumf>, %8, %cst_7 [1] : vector<8x128xf32> to vector<8xf32>
    %10 = vector.shape_cast %9 : vector<8xf32> to vector<8x1xf32>
    %11 = tpu.iota {dimensions = array<i32: 1>} : vector<8x128xi32>
    %12 = vector.broadcast %10 : vector<8x1xf32> to vector<8x128xf32>
    %13 = arith.cmpf oeq, %8, %12 : vector<8x128xf32>
    %c128_i32 = arith.constant 128 : i32
    %14 = vector.broadcast %c128_i32 : i32 to vector<8x128xi32>
    %15 = arith.select %13, %11, %14 : vector<8x128xi1>, vector<8x128xi32>
    %cst_8 = arith.constant dense<2147483647> : vector<8xi32>
    %16 = vector.multi_reduction <minsi>, %15, %cst_8 [1] : vector<8x128xi32> to vector<8xi32>
    %17 = vector.shape_cast %16 : vector<8xi32> to vector<8x1xi32>
    %c0_9 = arith.constant 0 : index
    %c0_10 = arith.constant 0 : index
    %18 = vector.load %arg4[%c0_9, %c0_10] : memref<8x128xf32, #tpu.memory_space<vmem>>, vector<8x128xf32>
    %c0_i32 = arith.constant 0 : i32
    %19 = vector.broadcast %c0_i32 : i32 to vector<8x1xi32>
    %20 = arith.cmpi eq, %17, %19 : vector<8x1xi32>
    %21 = vector.extract_strided_slice %18 {offsets = [0, 0], sizes = [1, 128], strides = [1, 1]} : vector<8x128xf32> to vector<1x128xf32>
    %22 = vector.extract_strided_slice %18 {offsets = [1, 0], sizes = [1, 128], strides = [1, 1]} : vector<8x128xf32> to vector<1x128xf32>
    %23 = vector.shape_cast %20 : vector<8x1xi1> to vector<8x1xi1>
    %24 = vector.broadcast %23 : vector<8x1xi1> to vector<8x128xi1>
    %25 = vector.shape_cast %21 : vector<1x128xf32> to vector<1x128xf32>
    %26 = vector.broadcast %25 : vector<1x128xf32> to vector<8x128xf32>
    %27 = vector.shape_cast %22 : vector<1x128xf32> to vector<1x128xf32>
    %28 = vector.broadcast %27 : vector<1x128xf32> to vector<8x128xf32>
    %29 = arith.select %24, %26, %28 : vector<8x128xi1>, vector<8x128xf32>
    %30 = arith.addf %5, %29 : vector<8x128xf32>
    %31 = vector.extract_strided_slice %30 {offsets = [0, 0], sizes = [8, 5], strides = [1, 1]} : vector<8x128xf32> to vector<8x5xf32>
    %c0_11 = arith.constant 0 : index
    %c0_12 = arith.constant 0 : index
    %32 = vector.load %arg6[%c0_11, %c0_12] : memref<8x5xf32, #tpu.memory_space<vmem>>, vector<8x5xf32>
    tpu.vector_store %arg6[%c0_11, %c0_12], %31 {strides = array<i32>} : memref<8x5xf32, #tpu.memory_space<vmem>>, vector<8x5xf32>,
    return
  }
  func.func @transform_0(%arg0: i32) -> (i32, i32) {
    %c0_i32 = arith.constant 0 : i32
    %c0_i32_0 = arith.constant 0 : i32
    return %arg0, %c0_i32 : i32, i32
  }
  func.func @transform_1(%arg0: i32) -> (i32, i32) {
    %c0_i32 = arith.constant 0 : i32
    %c0_i32_0 = arith.constant 0 : i32
    %c0_i32_1 = arith.constant 0 : i32
    return %c0_i32, %c0_i32_0 : i32, i32
  }
  func.func @transform_2(%arg0: i32) -> (i32, i32) {
    %c0_i32 = arith.constant 0 : i32
    %c0_i32_0 = arith.constant 0 : i32
    %c0_i32_1 = arith.constant 0 : i32
    return %c0_i32, %c0_i32_0 : i32, i32
  }
  func.func @transform_3(%arg0: i32) -> (i32, i32) {
    %c0_i32 = arith.constant 0 : i32
    %c0_i32_0 = arith.constant 0 : i32
    %c0_i32_1 = arith.constant 0 : i32
    return %c0_i32, %c0_i32_0 : i32, i32
  }
  func.func @transform_4(%arg0: i32) -> (i32, i32) {
    %c0_i32 = arith.constant 0 : i32
    %c0_i32_0 = arith.constant 0 : i32
    %c0_i32_1 = arith.constant 0 : i32
    return %c0_i32, %c0_i32_0 : i32, i32
  }
  func.func @transform_5(%arg0: i32) -> (i32, i32) {
    %c0_i32 = arith.constant 0 : i32
    %c0_i32_0 = arith.constant 0 : i32
    return %arg0, %c0_i32 : i32, i32
  }
}

</mosaic_0001>

<bundles_post_ra>
// kernel: _forward.1
= control target key start
LH: loop header
LB: loop body
LE: loop exit
PB: predicated region body
PF: predicated region fallthrough
CT: control target
= control target key end

     0   :  { %10 = vsyncpa [#allocation3], 0  ;;  %s157_s21 = smov [#allocation2]   ;;  %s158_s23 = smov 64   ;;  %s208_s0 = inlined_call_operand.vmem [shape: bf16[8,32], index: 0, kind: input, shape index: {}]   ;;  %s209_s1 = inlined_call_operand.hbm [shape: bf16[32,128], index: 1, kind: input, shape index: {}]   ;;  %s210_s2 = inlined_call_operand.vmem [shape: f32[1,128], index: 2, kind: input, shape index: {}]   ;;  %s211_s3 = inlined_call_operand.vmem [shape: f32[8,128], index: 3, kind: input, shape index: {}]   ;;  %s212_s4 = inlined_call_operand.vmem [shape: f32[1,128], index: 4, kind: input, shape index: {}]   ;;  %s213_s5 = inlined_call_operand.vmem [shape: f32[8,5], index: 5, kind: output, shape index: {}]  }
   0x1   :  { %s17_s20 = sshll.u32 %s209_s1, 4  ;;  %s19_s22 = sshll.u32 %s157_s21, 4  ;;  %s18_s20 = int_to_ptr.hbm [resolvable:$true] %s17_s20  ;;  %s20_s22 = int_to_ptr.vmem [resolvable:$true] %s19_s22 }
   0x2   :  { %s159_s24 = smov 4  }
   0x3   :  { %25 = dma.hbm_to_vmem [thread:$0]  %s18_s20, 256, %s20_s22, [#allocation3], %s158_s23, %s158_s23, %s159_s24  }
   0x4   :  { %155 = dma.done.wait [#allocation3], 256  }
   0x5   :  { %156 = vsyncadd [#allocation3], 4294967040  ;;  %v125_v0 = vld [vmem:[#allocation2 + $0x8] sm:$0xff]  ;;  %v124_v1 = vld [vmem:[#allocation2] sm:$0xff]  ;;  %vm58_vm0 = vcmask 261120   ;;  %v82_v9 = vlaneseq  ;;  %vm108_vm4 = vcmask 39936  }
   0x6   :  { %68 = vmatpush.bf16.msra.mxu0 %v125_v0  ;;  %v37_v2 = vld [vmem:[%s208_s0] sm:$0xf] }
   0x7   :  { %v129_v3 = vld [vmem:[%s210_s2] ss:$0 sm:$0xff]  ;;  %v83_v10 = vand.u32 127, %v82_v9 }
   0x8   :  { %v130_v4 = vld [vmem:[%s212_s4] ss:$0 sm:$0xff] }
   0x9   :  { %v100_v20 = vld [vmem:[%s211_s3] sm:$0xff] }
   0xa   :  { %69 = vmatpush.bf16.msra.mxu0 %v124_v1  ;;  %v104_v24 = vperm.slane %v100_v20, 0  ;;  %v105_v25 = vperm.slane %v100_v20, 1 }
   0xd   :  { %123 = vmatmul.msk.bf16.vlgmr.msra.gmra.mxu0 %vm58_vm0, %v37_v2 }
  0x8a   :  { %v71_v5 = vpop.f32.mrf.mxu0 }
  0x8b   :  { %v72_v6 = vadd.f32 %v129_v3, %v71_v5 }
  0x8d   :  { %v79_v7 = vadd.f32 %v130_v4, %v72_v6 }
  0x8f   :  { %80 = vmax.xlane.f32.xlu0 %v79_v7 }
  0x92   :  { %v73_v8 = vpop.f32.mrf.mxu0 }
 0x102   :  { %v81_v11 = vpop.xlane.xlu0 %80 }
 0x103   :  { %vm84_vm1 = vcmp.eq.f32.partialorder %v79_v7, %v81_v11 }
 0x104   :  { %v85_v12 = vsel %vm84_vm1, %v83_v10, 128 }
 0x105   :  { %v87_v13 = vshra.s32 %v85_v12, 16  ;;  %v86_v15 = vand.u32 65535, %v85_v12 }
 0x107   :  { %v89_v14 = vcvt.s32.f32 %v87_v13  ;;  %v88_v17 = vcvt.s32.f32 %v86_v15 }
 0x109   :  { %90 = vmin.xlane.f32.xlu0 %v89_v14 }
 0x17c   :  { %v91_v16 = vpop.xlane.xlu0 %90 }
 0x17d   :  { %vm92_vm2 = vcmp.eq.f32.partialorder %v89_v14, %v91_v16  ;;  %v97_v19 = vcvt.f32.s32 %v91_v16 }
 0x17e   :  { %v93_v18 = vsel %vm92_vm2, %v88_v17, inf }
 0x17f   :  { %94 = vmin.xlane.f32.xlu1 %v93_v18  ;;  %v98_v22 = vshll.u32 %v97_v19, 16 }
 0x1f2   :  { %v95_v21 = vpop.xlane.xlu1 %94 }
 0x1f3   :  { %v96_v23 = vcvt.f32.s32 %v95_v21 }
 0x1f5   :  { %v99_v26 = vadd.s32 %v98_v22, %v96_v23 }
 0x1f7   :  { %vm101_vm3 = vcmp.eq.s32.totalorder %v99_v26, 0 }
 0x1f8   :  { %v106_v27 = vsel %vm101_vm3, %v104_v24, %v105_v25 }
 0x1f9   :  { %v107_v28 = vadd.f32 %v106_v27, %v72_v6 }
 0x1fb   :  { %109 = vst.msk [vmem:[%s213_s5] sm:$0xff] %vm108_vm4, %v107_v28 }
 0x1fc   :  { %114 = vsyncpa [#allocation3], 1 }

</bundles_post_ra>
